<compile_context>
chip_gen: v7x
topology: tpu7x:2x2x1
jax: 0.10.0
libtpu: 0.0.40
codegen_flags: <defaults>
</compile_context>

<pallas_src>
import functools

import jax
import jax.numpy as jnp
from jax.experimental import pallas as pl
from jax.experimental.pallas import tpu as pltpu


def _round_up(a: int, b: int) -> int:
    return (a + b - 1) // b * b


def _vmem_capacity_bytes() -> int:
    """Physical VMEM per TensorCore; conservative 64 MiB (v7x) if unknown."""
    try:
        info = pltpu.get_tpu_info()
        cap = int(getattr(info, "vmem_capacity_bytes", 0) or 0)
        if cap > 0:
            return cap
    except Exception:
        pass
    return 64 * 1024 * 1024


def _choose_th(Hp: int, cap: int) -> int:
    """Largest multiple of 128 that divides Hp and is <= cap (>= 128)."""
    best, c = 128, 128
    while c <= min(cap, Hp):
        if Hp % c == 0:
            best = c
        c += 128
    return best


# --------------------------- kernels ---------------------------------------

def ffn_resident_kernel(x_ref, w1_ref, b1_ref, w2_ref, b2_ref, o_ref):
    # Weights fully VMEM-resident; single step per M tile.
    x = x_ref[...].astype(w1_ref.dtype)
    h = jnp.dot(x, w1_ref[...], preferred_element_type=jnp.float32) + b1_ref[...]
    h = jnp.maximum(h, 0.0)                 # ReLU; dropout = identity (eval)
    y = jnp.dot(h.astype(w2_ref.dtype), w2_ref[...],
                preferred_element_type=jnp.float32) + b2_ref[...]
    o_ref[...] = y.astype(o_ref.dtype)


def ffn_stream_f32_kernel(x_ref, w1_ref, b1_ref, w2_ref, b2_ref, o_ref):
    # H-tiled reduction; f32 output accumulated directly into resident o_ref.
    j = pl.program_id(1)
    x = x_ref[...].astype(w1_ref.dtype)
    h = jnp.maximum(
        jnp.dot(x, w1_ref[...], preferred_element_type=jnp.float32) + b1_ref[...],
        0.0)
    contrib = jnp.dot(h.astype(w2_ref.dtype), w2_ref[...],
                      preferred_element_type=jnp.float32)

    @pl.when(j == 0)
    def _():
        o_ref[...] = contrib + b2_ref[...]

    @pl.when(j > 0)
    def _():
        o_ref[...] += contrib


def ffn_stream_kernel(x_ref, w1_ref, b1_ref, w2_ref, b2_ref, o_ref, acc_ref):
    # H-tiled reduction; generic output dtype via f32 accumulator scratch.
    j = pl.program_id(1)
    x = x_ref[...].astype(w1_ref.dtype)
    h = jnp.maximum(
        jnp.dot(x, w1_ref[...], preferred_element_type=jnp.float32) + b1_ref[...],
        0.0)
    contrib = jnp.dot(h.astype(w2_ref.dtype), w2_ref[...],
                      preferred_element_type=jnp.float32)

    @pl.when(j == 0)
    def _():
        acc_ref[...] = contrib + b2_ref[...]

    @pl.when(j > 0)
    def _():
        acc_ref[...] += contrib

    @pl.when(j == pl.num_programs(1) - 1)
    def _():
        o_ref[...] = acc_ref[...].astype(o_ref.dtype)


# --------------------------- wrappers ---------------------------------------

def prepare_ffn_params(w1, b1, w2, b2, *, compute_dtype=jnp.bfloat16):
    """One-time weight prep: transpose to (D,H)/(H,D), pad to lane-aligned
    shapes, cast MXU operands to bf16.  Returns a dict of ARRAYS only (all
    tiling integers are re-derived from shapes inside feed_forward)."""
    H, D = w1.shape                      # PyTorch layout: layer1.weight is (H, D)
    Dp = _round_up(D, 128)
    Hp = _round_up(H, 128)
    w1_t = jnp.zeros((Dp, Hp), compute_dtype).at[:D, :H].set(
        jnp.asarray(w1).T.astype(compute_dtype))
    w2_t = jnp.zeros((Hp, Dp), compute_dtype).at[:H, :D].set(
        jnp.asarray(w2).T.astype(compute_dtype))
    b1_p = jnp.zeros((1, Hp), jnp.float32).at[0, :H].set(
        jnp.asarray(b1).astype(jnp.float32))
    b2_p = jnp.zeros((1, Dp), jnp.float32).at[0, :D].set(
        jnp.asarray(b2).astype(jnp.float32))
    return dict(w1=w1_t, b1=b1_p, w2=w2_t, b2=b2_p)


@functools.partial(jax.jit, static_argnames=("out_dtype", "training", "force_path"))
def feed_forward(x, params, *, out_dtype=None, training=False, force_path=None):
    """x: [..., D]; params from prepare_ffn_params.
    force_path in {None, "resident", "stream"} (mainly for testing)."""
    if training:
        # TODO(synk): training-mode dropout not implemented in the kernel.
        raise NotImplementedError("training-mode dropout not implemented")

    w1, b1, w2, b2 = params["w1"], params["b1"], params["w2"], params["b2"]
    Dp, Hp = w1.shape                      # static ints (from array shapes)
    *lead, D = x.shape
    M = 1
    for s in lead:
        M *= s

    out_dtype = jnp.dtype(x.dtype) if out_dtype is None else jnp.dtype(out_dtype)
    x_item = jnp.dtype(x.dtype).itemsize
    out_item = out_dtype.itemsize

    vmem_cap = _vmem_capacity_bytes()
    budget = int(vmem_cap * 0.72)                      # leave compiler headroom
    big_vmem = vmem_cap >= 100 * 1024 * 1024           # v5e / v6e (128 MiB)

    def stream_footprint(tm_, th_, scratch_):
        f = tm_ * Dp * x_item * 2                      # x tile (double-buffered)
        f += 2 * (Dp * th_ * 2) * 2                    # W1 + W2 chunks (bf16, 2x buf)
        f += (th_ + Dp) * 4 * 2                        # bias chunks
        f += tm_ * Dp * out_item * 2                   # output tile
        f += tm_ * th_ * 6                             # hidden intermediate
        if scratch_:
            f += tm_ * Dp * 4
        return f

    def resident_footprint(tm_):
        f = 2 * (Dp * Hp * 2) * 2                      # W1 + W2 fully resident
        f += (Hp + Dp) * 4 * 2
        f += tm_ * Dp * x_item * 2
        f += tm_ * Dp * out_item * 2
        f += tm_ * Hp * 6                              # hidden activations for a tile
        return f

    resident = resident_footprint(128) <= budget
    if force_path == "resident":
        resident = True
    elif force_path == "stream":
        resident = False

    tm_max = 1024 if big_vmem else 512
    if resident:
        th = Hp
        use_scratch = False
        tm = 128
        for cand in (1024, 512, 256, 128):
            if cand <= tm_max and resident_footprint(cand) <= budget:
                tm = cand
                break
    else:
        th = _choose_th(Hp, 1024 if big_vmem else 512)
        use_scratch = out_dtype != jnp.dtype(jnp.float32)
        tm = 128
        for cand in (tm_max, tm_max // 2, 256, 128):
            if cand >= 128 and stream_footprint(cand, th, use_scratch) <= budget:
                tm = cand
                break

    # Shrink tile for small inputs; keep >= 2 steps on the 'parallel' M axis
    # when possible (v7x megacore: 2 TensorCores).
    tm = min(tm, _round_up(M, 8))
    if _round_up(M, tm) // tm < 2 and M > 8:
        tm = max(8, _round_up(M, 16) // 2)
    Mp = _round_up(M, tm)

    fp = resident_footprint(tm) if resident else stream_footprint(tm, th, use_scratch)
    vmem_limit = int(min(vmem_cap * 0.82, max(fp * 1.5, 32 * 1024 * 1024)))

    # Pad only when needed (native dtype; bf16 cast happens inside the kernel).
    x2 = x.reshape(M, D)
    if (Mp != M) or (Dp != D):
        x2 = jnp.zeros((Mp, Dp), x.dtype).at[:M, :D].set(x2)

    weight_reads = 1 if resident else (Mp // tm)
    cost = pl.CostEstimate(
        flops=4 * Mp * Dp * Hp,
        transcendentals=0,
        bytes_accessed=(Mp * Dp * x_item + Mp * Dp * out_item
                        + weight_reads * (2 * Dp * Hp * 2 + (Hp + Dp) * 4)),
    )

    if resident:
        out = pl.pallas_call(
            ffn_resident_kernel,
            out_shape=jax.ShapeDtypeStruct((Mp, Dp), out_dtype),
            grid_spec=pltpu.PrefetchScalarGridSpec(
                num_scalar_prefetch=0,
                grid=(Mp // tm,),
                in_specs=[
                    pl.BlockSpec((tm, Dp), lambda i: (i, 0)),   # x rows
                    pl.BlockSpec((Dp, Hp), lambda i: (0, 0)),   # W1^T (resident)
                    pl.BlockSpec((1, Hp), lambda i: (0, 0)),    # b1
                    pl.BlockSpec((Hp, Dp), lambda i: (0, 0)),   # W2^T (resident)
                    pl.BlockSpec((1, Dp), lambda i: (0, 0)),    # b2
                ],
                out_specs=pl.BlockSpec((tm, Dp), lambda i: (i, 0)),
            ),
            compiler_params=pltpu.CompilerParams(
                dimension_semantics=("parallel",),
                vmem_limit_bytes=vmem_limit),
            cost_estimate=cost,
        )(x2, w1, b1, w2, b2)
    else:
        kernel = ffn_stream_kernel if use_scratch else ffn_stream_f32_kernel
        scratch = (pltpu.VMEM((tm, Dp), jnp.float32),) if use_scratch else ()
        out = pl.pallas_call(
            kernel,
            out_shape=jax.ShapeDtypeStruct((Mp, Dp), out_dtype),
            grid_spec=pltpu.PrefetchScalarGridSpec(
                num_scalar_prefetch=0,
                grid=(Mp // tm, Hp // th),                      # H reduction innermost
                in_specs=[
                    pl.BlockSpec((tm, Dp), lambda i, j: (i, 0)),   # x rows
                    pl.BlockSpec((Dp, th), lambda i, j: (0, j)),   # W1^T H-chunk
                    pl.BlockSpec((1, th), lambda i, j: (0, j)),    # b1  H-chunk
                    pl.BlockSpec((th, Dp), lambda i, j: (j, 0)),   # W2^T H-chunk
                    pl.BlockSpec((1, Dp), lambda i, j: (0, 0)),    # b2
                ],
                out_specs=pl.BlockSpec((tm, Dp), lambda i, j: (i, 0)),
                scratch_shapes=scratch,
            ),
            compiler_params=pltpu.CompilerParams(
                dimension_semantics=("parallel", "arbitrary"),
                vmem_limit_bytes=vmem_limit),
            cost_estimate=cost,
        )(x2, w1, b1, w2, b2)

    return out[:M, :D].reshape(tuple(lead) + (D,))


def init_params(key, input_dim, hidden_layers, dtype=jnp.float32):
    """Deterministic init mirroring nn.Linear's U(-1/sqrt(fan_in), 1/sqrt(fan_in))."""
    k1, k2, k3, k4 = jax.random.split(key, 4)
    bound1 = 1.0 / (input_dim ** 0.5)
    bound2 = 1.0 / (hidden_layers ** 0.5)
    w1 = jax.random.uniform(k1, (hidden_layers, input_dim), dtype, -bound1, bound1)
    b1 = jax.random.uniform(k2, (hidden_layers,), dtype, -bound1, bound1)
    w2 = jax.random.uniform(k3, (input_dim, hidden_layers), dtype, -bound2, bound2)
    b2 = jax.random.uniform(k4, (input_dim,), dtype, -bound2, bound2)
    return w1, b1, w2, b2


if __name__ == "__main__":
    # Small shapes consistent with the module: batch=2, seq=8, input_dim=32, hidden=64
    B, S, D, H = 2, 8, 32, 64
    key = jax.random.PRNGKey(0)
    kx, kp = jax.random.split(key)
    x = jax.random.normal(kx, (B, S, D), jnp.float32)
    w1, b1, w2, b2 = init_params(kp, D, H)

    params = prepare_ffn_params(w1, b1, w2, b2)   # one-time weight prep

    # Pure-JAX f32 reference of the intended forward pass (kernel uses bf16
    # MXU operands, so compare with a correspondingly loose tolerance).
    h_ref = jnp.maximum(x @ w1.T + b1, 0.0)
    y_ref = h_ref @ w2.T + b2

    # Default path (VMEM-resident weights at these sizes).
    out = jax.block_until_ready(feed_forward(x, params))
    assert out.shape == (B, S, D)
    assert jnp.allclose(out, y_ref, atol=5e-2, rtol=5e-2), (
        float(jnp.max(jnp.abs(out - y_ref))))

    # Force the H-tiled streaming path to exercise the reduction kernel too.
    out_s = jax.block_until_ready(feed_forward(x, params, force_path="stream"))
    assert out_s.shape == (B, S, D)
    assert jnp.allclose(out_s, y_ref, atol=5e-2, rtol=5e-2), (
        float(jnp.max(jnp.abs(out_s - y_ref))))

    print("KERNEL_OK")
</pallas_src>

<mosaic_0001>
module attributes {stable_mosaic.version = 11 : i64} {
  func.func @ffn_resident_kernel(%arg0: i32, %arg1: memref<8x128xf32, #tpu.memory_space<vmem>>, %arg2: memref<128x128xbf16, #tpu.memory_space<vmem>>, %arg3: memref<1x128xf32, #tpu.memory_space<vmem>>, %arg4: memref<128x128xbf16, #tpu.memory_space<vmem>>, %arg5: memref<1x128xf32, #tpu.memory_space<vmem>>, %arg6: memref<8x128xf32, #tpu.memory_space<vmem>>) attributes {dimension_semantics = [#tpu.dimension_semantics<parallel>], iteration_bounds = array<i64: 2>, scalar_prefetch = 0 : i64, scratch_operands = 0 : i64, tpu.core_type = #tpu.core_type<tc>, window_params = [{transform_indices = @transform_0, window_bounds = array<i64: 8, 128>}, {pipeline_mode = #tpu.pipeline_mode<synchronous>, transform_indices = @transform_1, window_bounds = array<i64: 128, 128>}, {pipeline_mode = #tpu.pipeline_mode<synchronous>, transform_indices = @transform_2, window_bounds = array<i64: 1, 128>}, {pipeline_mode = #tpu.pipeline_mode<synchronous>, transform_indices = @transform_3, window_bounds = array<i64: 128, 128>}, {pipeline_mode = #tpu.pipeline_mode<synchronous>, transform_indices = @transform_4, window_bounds = array<i64: 1, 128>}, {transform_indices = @transform_5, window_bounds = array<i64: 8, 128>}]} {
    %c0 = arith.constant 0 : index
    %c0_0 = arith.constant 0 : index
    %0 = vector.load %arg1[%c0, %c0_0] : memref<8x128xf32, #tpu.memory_space<vmem>>, vector<8x128xf32>
    %1 = arith.truncf %0 : vector<8x128xf32> to vector<8x128xbf16>
    %c0_1 = arith.constant 0 : index
    %c0_2 = arith.constant 0 : index
    %2 = vector.load %arg2[%c0_1, %c0_2] : memref<128x128xbf16, #tpu.memory_space<vmem>>, vector<128x128xbf16>
    %cst = arith.constant dense<0.000000e+00> : vector<8x128xf32>
    %3 = tpu.matmul %1, %2, %cst {dimension_numbers = #tpu.dot_dimension_numbers<[1], [0], [0], [1], [0, 0, 1, 1], [], []>} : vector<8x128xbf16>, vector<128x128xbf16>, vector<8x128xf32> -> vector<8x128xf32>
    %c0_3 = arith.constant 0 : index
    %c0_4 = arith.constant 0 : index
    %4 = vector.load %arg3[%c0_3, %c0_4] : memref<1x128xf32, #tpu.memory_space<vmem>>, vector<1x128xf32>
    %5 = vector.broadcast %4 : vector<1x128xf32> to vector<8x128xf32>
    %6 = arith.addf %3, %5 : vector<8x128xf32>
    %cst_5 = arith.constant 0.000000e+00 : f32
    %7 = vector.broadcast %cst_5 : f32 to vector<8x128xf32>
    %8 = arith.maximumf %6, %7 : vector<8x128xf32>
    %9 = arith.truncf %8 : vector<8x128xf32> to vector<8x128xbf16>
    %c0_6 = arith.constant 0 : index
    %c0_7 = arith.constant 0 : index
    %10 = vector.load %arg4[%c0_6, %c0_7] : memref<128x128xbf16, #tpu.memory_space<vmem>>, vector<128x128xbf16>
    %cst_8 = arith.constant dense<0.000000e+00> : vector<8x128xf32>
    %11 = tpu.matmul %9, %10, %cst_8 {dimension_numbers = #tpu.dot_dimension_numbers<[1], [0], [0], [1], [0, 0, 1, 1], [], []>} : vector<8x128xbf16>, vector<128x128xbf16>, vector<8x128xf32> -> vector<8x128xf32>
    %c0_9 = arith.constant 0 : index
    %c0_10 = arith.constant 0 : index
    %12 = vector.load %arg5[%c0_9, %c0_10] : memref<1x128xf32, #tpu.memory_space<vmem>>, vector<1x128xf32>
    %13 = vector.broadcast %12 : vector<1x128xf32> to vector<8x128xf32>
    %14 = arith.addf %11, %13 : vector<8x128xf32>
    %c0_11 = arith.constant 0 : index
    %c0_12 = arith.constant 0 : index
    %15 = vector.load %arg6[%c0_11, %c0_12] : memref<8x128xf32, #tpu.memory_space<vmem>>, vector<8x128xf32>
    tpu.vector_store %arg6[%c0_11, %c0_12], %14 {strides = array<i32>} : memref<8x128xf32, #tpu.memory_space<vmem>>, vector<8x128xf32>,
    return
  }
  func.func @transform_0(%arg0: i32) -> (i32, i32) {
    %c0_i32 = arith.constant 0 : i32
    %c0_i32_0 = arith.constant 0 : i32
    return %arg0, %c0_i32 : i32, i32
  }
  func.func @transform_1(%arg0: i32) -> (i32, i32) {
    %c0_i32 = arith.constant 0 : i32
    %c0_i32_0 = arith.constant 0 : i32
    %c0_i32_1 = arith.constant 0 : i32
    return %c0_i32, %c0_i32_0 : i32, i32
  }
  func.func @transform_2(%arg0: i32) -> (i32, i32) {
    %c0_i32 = arith.constant 0 : i32
    %c0_i32_0 = arith.constant 0 : i32
    %c0_i32_1 = arith.constant 0 : i32
    return %c0_i32, %c0_i32_0 : i32, i32
  }
  func.func @transform_3(%arg0: i32) -> (i32, i32) {
    %c0_i32 = arith.constant 0 : i32
    %c0_i32_0 = arith.constant 0 : i32
    %c0_i32_1 = arith.constant 0 : i32
    return %c0_i32, %c0_i32_0 : i32, i32
  }
  func.func @transform_4(%arg0: i32) -> (i32, i32) {
    %c0_i32 = arith.constant 0 : i32
    %c0_i32_0 = arith.constant 0 : i32
    %c0_i32_1 = arith.constant 0 : i32
    return %c0_i32, %c0_i32_0 : i32, i32
  }
  func.func @transform_5(%arg0: i32) -> (i32, i32) {
    %c0_i32 = arith.constant 0 : i32
    %c0_i32_0 = arith.constant 0 : i32
    return %arg0, %c0_i32 : i32, i32
  }
}

</mosaic_0001>

<bundles_post_ra>
// kernel: feed_forward.1
= control target key start
LH: loop header
LB: loop body
LE: loop exit
PB: predicated region body
PF: predicated region fallthrough
CT: control target
= control target key end

     0   :  { %10 = vsyncpa [#allocation3], 0  ;;  %s729_s18 = smov 0   ;;  %s822_s0 = inlined_call_operand.vmem [shape: f32[16,128], index: 0, kind: input, shape index: {}]   ;;  %s823_s1 = inlined_call_operand.vmem [shape: bf16[128,128], index: 1, kind: input, shape index: {}]   ;;  %s824_s2 = inlined_call_operand.vmem [shape: f32[1,128], index: 2, kind: input, shape index: {}]   ;;  %s825_s3 = inlined_call_operand.hbm [shape: bf16[128,128], index: 3, kind: input, shape index: {}]   ;;  %s826_s4 = inlined_call_operand.vmem [shape: f32[1,128], index: 4, kind: input, shape index: {}]   ;;  %s827_s5 = inlined_call_operand.vmem [shape: f32[16,128], index: 5, kind: output, shape index: {}]  }
   0x1 LB: > { %s735_s19 = sadd.s32 4294967295, %s692_s18   ;;  %p530_p0 = scmp.ge.s32.totalorder %s692_s18, 1  ;;  %s692_s18 = sphi %s729_s18, %s16_s18  }
   0x2   : > { %p157_p1 = scmp.lt.s32.totalorder %s692_s18, 3  ;;  %s694_s20 = smov [#allocation2]  }
   0x3   : > { %s175_s21 = sshll.u32 %s694_s20, 4  ;;  %p828_p3 = scmp.eq.s32.totalorder %s735_s19, 0  ;;  %s176_s21 = int_to_ptr.vmem [resolvable:$true] %s175_s21 }
   0x4   : > { %p739_p2 = pnand %p530_p0, %p157_p1  ;;  %s654_s26 = scalar_lea.hbm %s825_s3, 1024 }
   0x5   : > { %p655_p6 = scmp.ne.s32.totalorder %s825_s3, %s654_s26  ;;  %p661_p10 = scmp.lt.u32.totalorder %s654_s26, %s825_s3 }
   0x6   : > { %s830_s22 = scalar_select %p739_p2, 1, 0 }
   0x7   : > { %p619_p4 = pneg %p739_p2 }
   0x9   : > { %p748_p5 = pnand %p828_p3, %p619_p4 }
   0xb   : > { %p656_p7 = pneg %p748_p5 }
   0xd   : > { %p657_p8 = pnand %p656_p7, %p655_p6 }
   0xf   : > { %p658_p9 = pneg %p657_p8 }
  0x11   : > { %p663_p11 = pnand %p661_p10, %p658_p9 }
  0x13   : > { %666 = shalt.err (!%p663_p11)
}
  0x14   : > { %s667_s6 = scalar_lea.vmem %s176_s21, 1024  ;;  %p675_p1 = scmp.lt.s32.totalorder %s176_s21, %s176_s21 }
  0x15   : > { %p668_p12 = scmp.ne.s32.totalorder %s176_s21, %s667_s6  ;;  %p676_p4 = scmp.lt.s32.totalorder %s667_s6, %s667_s6 }
  0x17   : > { %p670_p13 = pnand %p668_p12, %p656_p7  ;;  %p677_p3 = por %p676_p4, %p675_p1 }
  0x19   : > { %p671_p0 = pneg %p670_p13 }
  0x1b   : > { %p678_p2 = pnand %p677_p3, %p671_p0 }
  0x1d   : > { %681 = shalt.err (!%p678_p2)
}
  0x1e   : > { %s695_s7 = smov 64   ;;  %s696_s8 = smov 4  }
  0x1f   : > { %622 = dma.hbm_to_vmem [thread:$0]  (!%p748_p5), %s825_s3, 1024, %s176_s21, [#allocation3], %s695_s7, %s695_s7, %s696_s8  }
  0x20   : > { %p832_p6 = scmp.ne.s32.totalorder %s830_s22, 0 }
  0x21   : > { %p833_p8 = scmp.eq.s32.totalorder (!%p832_p6), %s735_s19, 0 }
  0x22   : > { %201 = sbr.rel (%p832_p6) target bundleno = 509 (0x1fd), region = 40 }
  0x29   : > { %687 = dma.done.wait (%p833_p8), [#allocation3], 1024   ;;  %p834_p7 = pmov %p833_p8 }
  0x2a   : > { %v697_v0 = vmov 0.0   ;;  %vm698_vm0 = vmmov 0   ;;  %v638_v1 = vld [vmem:[%s823_s1] sm:$0xff]   ;;  %v639_v2 = vld [vmem:[%s823_s1 + $0x8] sm:$0xff]   ;;  %v640_v3 = vld [vmem:[%s823_s1 + $0x10] sm:$0xff]   ;;  %p227_p2 = scmp.lt.s32.totalorder %s735_s19, 1 }
  0x2b   : > { %689 = vsyncadd (%p834_p7), [#allocation3], 4294966272  ;;  %575 = vmatprep.subr.bf16.mxu0 %v697_v0  ;;  %591 = vmatprep.mubr.msk.bf16.mxu0 %vm698_vm0, %v697_v0  ;;  %v646_v4 = vld [vmem:[#allocation2] sm:$0xff]   ;;  %v641_v5 = vld [vmem:[%s823_s1 + $0x18] sm:$0xff]  }
  0x2c   : > { %595 = vmatprep.subr.bf16.mxu1 %v697_v0  ;;  %611 = vmatprep.mubr.msk.bf16.mxu1 %vm698_vm0, %v697_v0  ;;  %v647_v6 = vld [vmem:[#allocation2 + $0x8] sm:$0xff]   ;;  %v642_v7 = vld [vmem:[%s823_s1 + $0x20] sm:$0xff]   ;;  %v648_v8 = vld [vmem:[#allocation2 + $0x10] sm:$0xff]   ;;  %s836_s19 = smov (!%p227_p2, %s735_s19), 1 }
  0x2d   : > { %576 = vmatpush3.bf16.msra.mxu0 %v638_v1  ;;  %596 = vmatpush3.bf16.msra.mxu1 %v646_v4  ;;  %v643_v9 = vld [vmem:[%s823_s1 + $0x28] sm:$0xff]   ;;  %v649_v10 = vld [vmem:[#allocation2 + $0x18] sm:$0xff]   ;;  %s535_s25 = sshll.u32 %s836_s19, 3  ;;  %v644_v11 = vld [vmem:[%s823_s1 + $0x30] sm:$0xff]  }
  0x2e   : > { %577 = vmatprep.subr.bf16.mxu0 %v697_v0  ;;  %597 = vmatprep.subr.bf16.mxu1 %v697_v0  ;;  %s230_s30 = scalar_lea.vmem %s822_s0, %s535_s25  ;;  %v650_v12 = vld [vmem:[#allocation2 + $0x20] sm:$0xff]   ;;  %v645_v13 = vld [vmem:[%s823_s1 + $0x38] sm:$0xff]   ;;  %v651_v15 = vld [vmem:[#allocation2 + $0x28] sm:$0xff]   ;;  %s234_s14 = scalar_lea.vmem %s827_s5, %s535_s25 }
  0x2f   : > { %v236_v14 = vld [vmem:[%s230_s30] sm:$0xff]  ;;  %v652_v17 = vld [vmem:[#allocation2 + $0x30] sm:$0xff]   ;;  %v653_v18 = vld [vmem:[#allocation2 + $0x38] sm:$0xff]  }
  0x30   : > { %v237_v16 = vpack.c.bf16 %v236_v14, %v236_v14  ;;  %v537_v19 = vld [vmem:[%s824_s2] ss:$0 sm:$0xff] }
  0x31   : > { %578 = vmatpush3.bf16.msra.mxu0 %v639_v2  ;;  %598 = vmatpush3.bf16.msra.mxu1 %v647_v6  ;;  %v546_v27 = vld [vmem:[%s826_s4] ss:$0 sm:$0xff] }
  0x32   : > { %579 = vmatprep.subr.bf16.mxu0 %v697_v0  ;;  %599 = vmatprep.subr.bf16.mxu1 %v697_v0 }
  0x35   : > { %580 = vmatpush3.bf16.msra.mxu0 %v640_v3  ;;  %600 = vmatpush3.bf16.msra.mxu1 %v648_v8 }
  0x36   : > { %581 = vmatprep.subr.bf16.mxu0 %v697_v0  ;;  %601 = vmatprep.subr.bf16.mxu1 %v697_v0 }
  0x39   : > { %582 = vmatpush3.bf16.msra.mxu0 %v641_v5  ;;  %602 = vmatpush3.bf16.msra.mxu1 %v649_v10 }
  0x3a   : > { %583 = vmatprep.subr.bf16.mxu0 %v697_v0  ;;  %603 = vmatprep.subr.bf16.mxu1 %v697_v0 }
  0x3d   : > { %584 = vmatpush3.bf16.msra.mxu0 %v642_v7  ;;  %604 = vmatpush3.bf16.msra.mxu1 %v650_v12 }
  0x3e   : > { %585 = vmatprep.subr.bf16.mxu0 %v697_v0  ;;  %605 = vmatprep.subr.bf16.mxu1 %v697_v0 }
  0x41   : > { %586 = vmatpush3.bf16.msra.mxu0 %v643_v9  ;;  %606 = vmatpush3.bf16.msra.mxu1 %v651_v15 }
  0x42   : > { %587 = vmatprep.subr.bf16.mxu0 %v697_v0  ;;  %607 = vmatprep.subr.bf16.mxu1 %v697_v0 }
  0x45   : > { %588 = vmatpush3.bf16.msra.mxu0 %v644_v11  ;;  %608 = vmatpush3.bf16.msra.mxu1 %v652_v17 }
  0x46   : > { %589 = vmatprep.subr.bf16.mxu0 %v697_v0  ;;  %609 = vmatprep.subr.bf16.mxu1 %v697_v0 }
  0x49   : > { %590 = vmatpush3.bf16.msra.mxu0 %v645_v13  ;;  %610 = vmatpush3.bf16.msra.mxu1 %v653_v18 }
  0x4c   : > { %592 = vmatmul.mubr.bf16.vlgmr.msra.gmra.mrb[0].mxu0 %v237_v16 }
 0x11f   : > { %v343_v20 = vpop.f32.mrb[0].mxu0 }
 0x120   : > { %v344_v21 = vadd.f32 %v537_v19, %v343_v20  ;;  %v593_v22 = vpop.f32.mrb[1].mxu0 }
 0x121   : > { %v346_v23 = vpop.f32.mrb[2].mxu0 }
 0x122   : > { %v349_v24 = vmax.f32 %v344_v21, 0.0  ;;  %v594_v25 = vpop.f32.mrb[3].mxu0 }
 0x124   : > { %v350_v26 = vpack.c.bf16 %v349_v24, %v349_v24 }
 0x126   : > { %612 = vmatmul.mubr.bf16.vlgmr.msra.gmra.mrb[0].mxu1 %v350_v26 }
 0x1f9   : > { %v456_v28 = vpop.f32.mrb[0].mxu1 }
 0x1fa   : > { %v457_v29 = vadd.f32 %v546_v27, %v456_v28  ;;  %v613_v30 = vpop.f32.mrb[1].mxu1 }
 0x1fb   : > { %v459_v31 = vpop.f32.mrb[2].mxu1 }
 0x1fc   : > { %462 = vst [vmem:[%s234_s14] sm:$0xff] %v457_v29  ;;  %v614_v32 = vpop.f32.mrb[3].mxu1 }
 0x1fd PF: > { %s16_s18 = sadd.s32 1, %s692_s18  }
 0x1fe   : > { %p13_p3 = scmp.ge.s32.totalorder %s16_s18, 4  }
 0x200   :  { %15 = sbr.rel (!%p13_p3) target bundleno = 1 (0x1), region = 75 }
 0x207   :  { %482 = vsyncpa [#allocation3], 1 }
 0x208   :  { %484 = vsyncpa [#allocation3 + $0x1], 1 }

</bundles_post_ra>
